<compile_context>
chip_gen: v5e
topology: v5e:2x2
jax: 0.10.0
libtpu: 0.0.40
codegen_flags: <defaults>
</compile_context>

<pallas_src>
import functools

import jax
import jax.numpy as jnp
from jax import lax
from jax.experimental import pallas as pl
from jax.experimental.pallas import tpu as pltpu


def _vmem_limit_bytes():
    """~3/4 of physical VMEM (96 MiB on v5e/v6e, 48 MiB on v7x), capped at 100 MiB."""
    try:
        info = pltpu.get_tpu_info()
        cap = getattr(info, "vmem_capacity_bytes", None)
        if cap:
            return min(int(cap) * 3 // 4, 100 * 1024 * 1024)
    except Exception:
        pass
    return 48 * 1024 * 1024   # conservative fallback (safe on every generation)


_VMEM_LIMIT = _vmem_limit_bytes()

# Finite large-negative mask value: exp underflows to exactly 0, and a fully
# masked row can never produce exp(-inf - -inf) = NaN.
_MASK_VALUE = -0.7 * float(jnp.finfo(jnp.float32).max)


def _pick_tile(dim, target, multiple=1):
    """Largest tile <= target that divides `dim` and is a multiple of `multiple`."""
    if dim <= target:
        return dim
    t = target
    while t >= max(8, multiple):
        if dim % t == 0 and t % multiple == 0:
            return t
        t //= 2
    # TODO(synk): fall back to the full dim; pad instead if this ever exceeds VMEM.
    return dim


# ----------------------------------------------------------------------------
# Tiled linear kernel:  out = x @ W_eff + b   (LoRA already folded into W_eff)
# ----------------------------------------------------------------------------
def _linear_kernel(x_ref, w_ref, b_ref, o_ref, acc_ref):
    @pl.when(pl.program_id(2) == 0)
    def _init():
        acc_ref[...] = jnp.zeros_like(acc_ref)

    acc_ref[...] += jnp.dot(x_ref[...], w_ref[...],
                            preferred_element_type=jnp.float32)

    @pl.when(pl.program_id(2) == pl.num_programs(2) - 1)
    def _store():
        o_ref[...] = (acc_ref[...] + b_ref[...]).astype(o_ref.dtype)


def linear(x2d, w_eff, bias, *, block=(512, 512, 512)):
    """x2d: (M, K); w_eff: (K, N) pre-transposed + LoRA-folded; bias: (1, N) f32."""
    M, K = x2d.shape
    Kw, N = w_eff.shape
    assert K == Kw
    tm = _pick_tile(M, block[0])
    tn = _pick_tile(N, block[1])
    tk = _pick_tile(K, block[2])
    return pl.pallas_call(
        _linear_kernel,
        out_shape=jax.ShapeDtypeStruct((M, N), x2d.dtype),
        grid_spec=pltpu.PrefetchScalarGridSpec(
            num_scalar_prefetch=0,
            grid=(M // tm, N // tn, K // tk),
            in_specs=[pl.BlockSpec((tm, tk), lambda i, j, k: (i, k)),
                      pl.BlockSpec((tk, tn), lambda i, j, k: (k, j)),
                      pl.BlockSpec((1, tn), lambda i, j, k: (0, j))],
            out_specs=pl.BlockSpec((tm, tn), lambda i, j, k: (i, j)),
            scratch_shapes=[pltpu.VMEM((tm, tn), jnp.float32)]),
        compiler_params=pltpu.CompilerParams(
            dimension_semantics=("parallel", "parallel", "arbitrary"),
            vmem_limit_bytes=_VMEM_LIMIT),
    )(x2d, w_eff, bias)


# ----------------------------------------------------------------------------
# Linear + fused RoPE (for q_proj / k_proj).  RoPE rides on the matmul epilogue:
#   rotate_half(x) == pltpu.roll(x, D/2, lane axis) * sign, sign folded into sin.
# Requires the N tile to be head_dim aligned so every in-tile slab is one head.
# ----------------------------------------------------------------------------
def _linear_rope_kernel(x_ref, w_ref, b_ref, cos_ref, sin_ref, o_ref, acc_ref, *,
                        head_dim):
    @pl.when(pl.program_id(2) == 0)
    def _init():
        acc_ref[...] = jnp.zeros_like(acc_ref)

    acc_ref[...] += jnp.dot(x_ref[...], w_ref[...],
                            preferred_element_type=jnp.float32)

    @pl.when(pl.program_id(2) == pl.num_programs(2) - 1)
    def _store():
        half = head_dim // 2
        cos = cos_ref[...]                 # (tm, head_dim) f32
        sin = sin_ref[...]                 # (tm, head_dim) f32, rotate_half sign folded
        heads_in_tile = o_ref.shape[1] // head_dim
        for h in range(heads_in_tile):     # per-head slabs keep the working set small
            hsl = slice(h * head_dim, (h + 1) * head_dim)
            yh = acc_ref[:, hsl] + b_ref[:, hsl]             # f32
            o_ref[:, hsl] = (yh * cos
                             + pltpu.roll(yh, half, axis=1) * sin).astype(o_ref.dtype)


def linear_rope(x2d, w_eff, bias, cos2d, sin2d, *, head_dim, block=(512, 512, 512)):
    M, K = x2d.shape
    Kw, N = w_eff.shape
    assert K == Kw and N % head_dim == 0
    tm = _pick_tile(M, block[0])
    tn = _pick_tile(N, block[1], multiple=head_dim)
    tk = _pick_tile(K, block[2])
    assert tn % head_dim == 0, "RoPE-fused output tile must be head aligned"
    kernel = functools.partial(_linear_rope_kernel, head_dim=head_dim)
    return pl.pallas_call(
        kernel,
        out_shape=jax.ShapeDtypeStruct((M, N), x2d.dtype),
        grid_spec=pltpu.PrefetchScalarGridSpec(
            num_scalar_prefetch=0,
            grid=(M // tm, N // tn, K // tk),
            in_specs=[pl.BlockSpec((tm, tk), lambda i, j, k: (i, k)),
                      pl.BlockSpec((tk, tn), lambda i, j, k: (k, j)),
                      pl.BlockSpec((1, tn), lambda i, j, k: (0, j)),
                      pl.BlockSpec((tm, head_dim), lambda i, j, k: (i, 0)),
                      pl.BlockSpec((tm, head_dim), lambda i, j, k: (i, 0))],
            out_specs=pl.BlockSpec((tm, tn), lambda i, j, k: (i, j)),
            scratch_shapes=[pltpu.VMEM((tm, tn), jnp.float32)]),
        compiler_params=pltpu.CompilerParams(
            dimension_semantics=("parallel", "parallel", "arbitrary"),
            vmem_limit_bytes=_VMEM_LIMIT),
    )(x2d, w_eff, bias, cos2d, sin2d)


# ----------------------------------------------------------------------------
# Flash attention on a flattened lower-triangular block schedule.
#   grid = (B, KVH, n_steps); scalar-prefetch arrays qi_of_step / ki_of_step pick
#   the (q block, kv block) pair -> dead causal blocks cost neither DMA nor a step.
#   q block: (tq, G*D) = all q heads of one kv group; k/v blocks: (tkv, D).
# ----------------------------------------------------------------------------
def _flash_attn_kernel(qs_ref, ks_ref, q_ref, k_ref, v_ref, o_ref,
                       m_sc, l_sc, acc_sc, *, tq, tkv, approx_reciprocal):
    gd = q_ref.shape[1]
    hd = k_ref.shape[1]
    groups = gd // hd

    step = pl.program_id(2)
    qi = qs_ref[step]
    ki = ks_ref[step]
    q_start = qi * tq
    kv_start = ki * tkv

    @pl.when(ki == 0)
    def _init():
        m_sc[...] = jnp.full_like(m_sc, -jnp.inf)
        l_sc[...] = jnp.zeros_like(l_sc)
        acc_sc[...] = jnp.zeros_like(acc_sc)

    def _accumulate(mask):
        # Online softmax for every q head of this kv group; k/v stream once per group.
        for g in range(groups):
            hsl = slice(g * hd, (g + 1) * hd)
            # Softmax scale is pre-folded into q_proj, so no `* scale` here.
            s = lax.dot_general(q_ref[:, hsl], k_ref[...],
                                (((1,), (1,)), ((), ())),
                                preferred_element_type=jnp.float32)     # (tq, tkv)
            if mask is not None:
                s = jnp.where(mask, s, _MASK_VALUE)
            m_prev = m_sc[:, g:g + 1]                                   # (tq, 1)
            m_new = jnp.maximum(m_prev, jnp.max(s, axis=-1, keepdims=True))
            alpha = jnp.exp(m_prev - m_new)
            p = jnp.exp(s - m_new)                                      # (tq, tkv) f32
            l_sc[:, g:g + 1] = alpha * l_sc[:, g:g + 1] + jnp.sum(
                p, axis=-1, keepdims=True)
            # Feed v straight from the ref: its live range stays inside the matmul.
            acc_sc[:, hsl] = alpha * acc_sc[:, hsl] + jnp.dot(
                p.astype(v_ref.dtype), v_ref[...],
                preferred_element_type=jnp.float32)
            m_sc[:, g:g + 1] = m_new

    # Fully-past kv block: skip all mask math (saves (tq, tkv) VPU passes).
    @pl.when(kv_start + tkv - 1 <= q_start)
    def _full():
        _accumulate(None)

    # Diagonal / partially-masked kv block: build the causal mask once, share it.
    @pl.when(kv_start + tkv - 1 > q_start)
    def _diag():
        rows = q_start + lax.broadcasted_iota(jnp.int32, (tq, tkv), 0)
        cols = kv_start + lax.broadcasted_iota(jnp.int32, (tq, tkv), 1)
        _accumulate(rows >= cols)

    # Last kv block of this q block: normalize and store the lane-dense (tq, G*D) slab.
    @pl.when(kv_start + tkv >= q_start + tq)
    def _finalize():
        l = l_sc[...]                                                   # (tq, G)
        inv = pl.reciprocal(l, approx=True) if approx_reciprocal else 1.0 / l
        for g in range(groups):
            hsl = slice(g * hd, (g + 1) * hd)
            o_ref[:, hsl] = (acc_sc[:, hsl] * inv[:, g:g + 1]).astype(o_ref.dtype)


def _causal_schedule(nq, nk, tq, tkv):
    """Lower-triangular (qi, ki) block pairs, qi-major, ki ascending (ki==0 first)."""
    qs, ks = [], []
    for qi in range(nq):
        last_ki = min(nk - 1, (qi * tq + tq - 1) // tkv)
        for ki in range(last_ki + 1):
            qs.append(qi)
            ks.append(ki)
    return jnp.asarray(qs, jnp.int32), jnp.asarray(ks, jnp.int32), len(qs)


def flash_attention(q, k, v, *, batch, seq, num_heads, num_kv_heads, head_dim,
                    block=(256, 256), approx_reciprocal=None):
    """q: (B*S, H*D); k, v: (B*S, KVH*D)  ->  (B*S, H*D).  q is pre-scaled by 1/sqrt(D).

    block: (tq, tkv).  Guidance: >=256 on v6e/v7x (256-wide MXU), 128 on v5e.
    # TODO(synk): on v7x with B*KVH < 2, split nq into the leading grid axis so both
    #             TensorCores stay busy (megacore occupancy).
    """
    groups = num_heads // num_kv_heads
    M = batch * seq
    tq = _pick_tile(seq, block[0])
    tkv = _pick_tile(seq, block[1])
    nq, nk = seq // tq, seq // tkv
    qs, ks, n_steps = _causal_schedule(nq, nk, tq, tkv)
    if approx_reciprocal is None:
        approx_reciprocal = (q.dtype != jnp.float32)
    gd = groups * head_dim
    kernel = functools.partial(_flash_attn_kernel, tq=tq, tkv=tkv,
                               approx_reciprocal=bool(approx_reciprocal))
    return pl.pallas_call(
        kernel,
        out_shape=jax.ShapeDtypeStruct((M, num_heads * head_dim), q.dtype),
        grid_spec=pltpu.PrefetchScalarGridSpec(
            num_scalar_prefetch=2,
            grid=(batch, num_kv_heads, n_steps),
            in_specs=[
                pl.BlockSpec((tq, gd),
                             lambda b, h, s, qs_r, ks_r: (b * nq + qs_r[s], h)),
                pl.BlockSpec((tkv, head_dim),
                             lambda b, h, s, qs_r, ks_r: (b * nk + ks_r[s], h)),
                pl.BlockSpec((tkv, head_dim),
                             lambda b, h, s, qs_r, ks_r: (b * nk + ks_r[s], h)),
            ],
            out_specs=pl.BlockSpec((tq, gd),
                                   lambda b, h, s, qs_r, ks_r: (b * nq + qs_r[s], h)),
            scratch_shapes=[pltpu.VMEM((tq, groups), jnp.float32),
                            pltpu.VMEM((tq, groups), jnp.float32),
                            pltpu.VMEM((tq, gd), jnp.float32)]),
        compiler_params=pltpu.CompilerParams(
            dimension_semantics=("parallel", "parallel", "arbitrary"),
            vmem_limit_bytes=_VMEM_LIMIT),
    )(qs, ks, q, k, v)


# ----------------------------------------------------------------------------
# Parameter preparation: fold LoRA + (for q_proj) the softmax scale, transpose once.
# ----------------------------------------------------------------------------
def prepare_params(params, cfg, dtype=jnp.float32):
    # TODO(synk): if LoRA adapters must stay hot-swappable, keep A/B separate and
    # pad r to 128 instead of folding into W_eff.
    scale = cfg["head_dim"] ** (-0.5)
    prepared = {}
    for name, p in params.items():
        w_eff = jnp.asarray(p["w"], jnp.float32).T                     # (K, N)
        if p.get("A") is not None and p.get("B") is not None:
            w_eff = w_eff + p["scaling"] * (
                jnp.asarray(p["A"], jnp.float32).T
                @ jnp.asarray(p["B"], jnp.float32).T)
        n_out = p["w"].shape[0]
        b = p["b"] if p["b"] is not None else jnp.zeros((n_out,), jnp.float32)
        b = jnp.asarray(b, jnp.float32)
        if name == "q_proj":            # fold softmax scale (commutes with RoPE)
            w_eff = w_eff * scale
            b = b * scale
        prepared[name] = (w_eff.astype(dtype), b.reshape(1, n_out))
    return prepared


# ----------------------------------------------------------------------------
# Qwen2Attention forward (Pallas)
# ----------------------------------------------------------------------------
def qwen2_attention_forward(prepared, cfg, hidden_states, position_embeddings,
                            *, proj_block=(512, 512, 512), attn_block=(256, 256)):
    B, S, HID = hidden_states.shape
    H = cfg["num_attention_heads"]
    KVH = cfg["num_key_value_heads"]
    D = cfg["head_dim"]

    compute_dtype = prepared["q_proj"][0].dtype

    cos, sin = position_embeddings                     # each (B, S, D), f32
    half = D // 2
    sign = jnp.concatenate([-jnp.ones((half,), jnp.float32),
                            jnp.ones((half,), jnp.float32)])
    cos2d = cos.astype(jnp.float32).reshape(B * S, D)
    sin2d = (sin.astype(jnp.float32) * sign).reshape(B * S, D)  # fold rotate_half sign

    # Everything stays in the flat (B*S, features) layout -> no wrapper transposes.
    x2d = hidden_states.reshape(B * S, HID).astype(compute_dtype)

    # q_proj/k_proj with fused RoPE (q also carries the folded softmax scale).
    q = linear_rope(x2d, *prepared["q_proj"], cos2d, sin2d,
                    head_dim=D, block=proj_block)               # (B*S, H*D)
    k = linear_rope(x2d, *prepared["k_proj"], cos2d, sin2d,
                    head_dim=D, block=proj_block)               # (B*S, KVH*D)
    v = linear(x2d, *prepared["v_proj"], block=proj_block)      # (B*S, KVH*D)

    attn = flash_attention(q, k, v, batch=B, seq=S, num_heads=H,
                           num_kv_heads=KVH, head_dim=D,
                           block=attn_block)                    # (B*S, H*D)

    out = linear(attn, *prepared["o_proj"], block=proj_block)   # (B*S, HID)
    return out.reshape(B, S, HID), None                         # attn_weights=None (SDPA path)


# ----------------------------------------------------------------------------
# Pure-JAX reference (mirrors the PyTorch module, unfused LoRA) for verification.
# ----------------------------------------------------------------------------
def _ref_forward(params, cfg, hidden_states, position_embeddings):
    B, S, HID = hidden_states.shape
    H, KVH, D = cfg["num_attention_heads"], cfg["num_key_value_heads"], cfg["head_dim"]
    groups = H // KVH
    scaling = D ** (-0.5)
    cos, sin = position_embeddings

    def lin(x2d, p):
        out = x2d @ p["w"].T
        if p["b"] is not None:
            out = out + p["b"]
        return out + (x2d @ p["A"].T @ p["B"].T) * p["scaling"]

    x2d = hidden_states.reshape(B * S, HID)
    q = lin(x2d, params["q_proj"]).reshape(B, S, H, D).transpose(0, 2, 1, 3)
    k = lin(x2d, params["k_proj"]).reshape(B, S, KVH, D).transpose(0, 2, 1, 3)
    v = lin(x2d, params["v_proj"]).reshape(B, S, KVH, D).transpose(0, 2, 1, 3)

    def rotate_half(x):
        x1, x2 = x[..., : D // 2], x[..., D // 2:]
        return jnp.concatenate([-x2, x1], axis=-1)

    c = cos[:, None, :, :]
    s = sin[:, None, :, :]
    q = q * c + rotate_half(q) * s
    k = k * c + rotate_half(k) * s

    k = jnp.repeat(k, groups, axis=1)
    v = jnp.repeat(v, groups, axis=1)

    scores = jnp.einsum("bhqd,bhkd->bhqk", q, k) * scaling
    mask = jnp.tril(jnp.ones((S, S), dtype=bool))
    scores = jnp.where(mask[None, None], scores, -jnp.inf)
    probs = jax.nn.softmax(scores, axis=-1)
    o = jnp.einsum("bhqk,bhkd->bhqd", probs, v)
    o = o.transpose(0, 2, 1, 3).reshape(B * S, H * D)
    return lin(o, params["o_proj"]).reshape(B, S, HID)


# ----------------------------------------------------------------------------
# Deterministic parameter init + rotary embeddings
# ----------------------------------------------------------------------------
def init_params(key, cfg, r=8, lora_alpha=32):
    HID = cfg["hidden_size"]
    H, KVH, D = cfg["num_attention_heads"], cfg["num_key_value_heads"], cfg["head_dim"]
    specs = {
        "q_proj": (H * D, HID, True),
        "k_proj": (KVH * D, HID, True),
        "v_proj": (KVH * D, HID, True),
        "o_proj": (HID, H * D, False),
    }
    params = {}
    for name, (out_f, in_f, bias) in specs.items():
        key, kw, kb, ka, kB = jax.random.split(key, 5)
        params[name] = {
            "w": 0.05 * jax.random.normal(kw, (out_f, in_f), jnp.float32),
            "b": (0.05 * jax.random.normal(kb, (out_f,), jnp.float32)) if bias else None,
            # NOTE: synthetic nonzero LoRA weights to exercise the LoRA branch
            # (PyTorch init would zero lora_B, making it a no-op).
            "A": 0.05 * jax.random.normal(ka, (r, in_f), jnp.float32),
            "B": 0.05 * jax.random.normal(kB, (out_f, r), jnp.float32),
            "scaling": lora_alpha / r,
        }
    return params


def make_rope(B, S, D, theta=10000.0):
    inv_freq = 1.0 / (theta ** (jnp.arange(0, D, 2, dtype=jnp.float32) / D))
    pos = jnp.arange(S, dtype=jnp.float32)
    freqs = pos[:, None] * inv_freq[None, :]               # (S, D/2)
    emb = jnp.concatenate([freqs, freqs], axis=-1)         # (S, D)
    cos = jnp.broadcast_to(jnp.cos(emb)[None], (B, S, D))
    sin = jnp.broadcast_to(jnp.sin(emb)[None], (B, S, D))
    return cos, sin


if __name__ == "__main__":
    # Small but TPU-friendly config: real Qwen2 head_dim=128 keeps all blocks
    # lane-aligned; S=32 with 16-wide attention blocks exercises the triangular
    # multi-step flash schedule and the diagonal-vs-full mask branches.
    cfg = dict(hidden_size=256, num_attention_heads=4, num_key_value_heads=2,
               head_dim=128, attention_dropout=0.0)

    key = jax.random.PRNGKey(0)
    key, kx = jax.random.split(key)
    B, S = 2, 32
    hidden_states = jax.random.normal(kx, (B, S, cfg["hidden_size"]), jnp.float32)
    position_embeddings = make_rope(B, S, cfg["head_dim"])
    params = init_params(key, cfg)

    ref = _ref_forward(params, cfg, hidden_states, position_embeddings)

    # --- f32 path, small tiles: exercises K-accumulation, per-head fused RoPE in
    #     128-wide output tiles and the 3-step triangular attention schedule ---
    prepared_f32 = prepare_params(params, cfg, jnp.float32)
    out, attn_weights = qwen2_attention_forward(
        prepared_f32, cfg, hidden_states, position_embeddings,
        proj_block=(32, 128, 128), attn_block=(16, 16))
    out = jax.block_until_ready(out)
    assert out.shape == (B, S, cfg["hidden_size"])
    assert attn_weights is None
    assert jnp.allclose(out, ref, rtol=1e-3, atol=1e-3), float(jnp.max(jnp.abs(out - ref)))

    # --- f32 path, default (large-tile) blocks: single-block fast path ---
    out_d, _ = qwen2_attention_forward(prepared_f32, cfg, hidden_states,
                                       position_embeddings)
    out_d = jax.block_until_ready(out_d)
    assert jnp.allclose(out_d, ref, rtol=1e-3, atol=1e-3), float(jnp.max(jnp.abs(out_d - ref)))

    # --- bf16 weights/activations path: loose tolerance vs the f32 reference ---
    prepared_bf16 = prepare_params(params, cfg, jnp.bfloat16)
    out_bf16, _ = qwen2_attention_forward(
        prepared_bf16, cfg, hidden_states, position_embeddings,
        proj_block=(32, 128, 128), attn_block=(16, 16))
    out_bf16 = jax.block_until_ready(out_bf16).astype(jnp.float32)
    assert jnp.allclose(out_bf16, ref, rtol=2e-1, atol=2e-1), \
        float(jnp.max(jnp.abs(out_bf16 - ref)))

    print("KERNEL_OK")
</pallas_src>

<mosaic_0001>
module attributes {stable_mosaic.version = 11 : i64} {
  func.func @_linear_rope_kernel(%arg0: i32, %arg1: i32, %arg2: i32, %arg3: memref<32x128xf32, #tpu.memory_space<vmem>>, %arg4: memref<128x128xf32, #tpu.memory_space<vmem>>, %arg5: memref<1x128xf32, #tpu.memory_space<vmem>>, %arg6: memref<32x128xf32, #tpu.memory_space<vmem>>, %arg7: memref<32x128xf32, #tpu.memory_space<vmem>>, %arg8: memref<32x128xf32, #tpu.memory_space<vmem>>, %arg9: memref<32x128xf32, #tpu.memory_space<vmem>>) attributes {dimension_semantics = [#tpu.dimension_semantics<parallel>, #tpu.dimension_semantics<parallel>, #tpu.dimension_semantics<arbitrary>], iteration_bounds = array<i64: 2, 4, 2>, scalar_prefetch = 0 : i64, scratch_operands = 1 : i64, tpu.core_type = #tpu.core_type<tc>, window_params = [{transform_indices = @transform_0, window_bounds = array<i64: 32, 128>}, {transform_indices = @transform_1, window_bounds = array<i64: 128, 128>}, {transform_indices = @transform_2, window_bounds = array<i64: 1, 128>}, {transform_indices = @transform_3, window_bounds = array<i64: 32, 128>}, {transform_indices = @transform_4, window_bounds = array<i64: 32, 128>}, {transform_indices = @transform_5, window_bounds = array<i64: 32, 128>}]} {
    %c0_i32 = arith.constant 0 : i32
    %0 = arith.cmpi eq, %arg2, %c0_i32 : i32
    %1 = arith.extui %0 : i1 to i32
    %c0_i32_0 = arith.constant 0 : i32
    %2 = arith.cmpi ne, %1, %c0_i32_0 : i32
    scf.if %2 {
      %cst_9 = arith.constant 0.000000e+00 : f32
      %12 = vector.broadcast %cst_9 : f32 to vector<32x128xf32>
      %c0_10 = arith.constant 0 : index
      %c0_11 = arith.constant 0 : index
      %13 = vector.load %arg9[%c0_10, %c0_11] : memref<32x128xf32, #tpu.memory_space<vmem>>, vector<32x128xf32>
      tpu.vector_store %arg9[%c0_10, %c0_11], %12 {strides = array<i32>} : memref<32x128xf32, #tpu.memory_space<vmem>>, vector<32x128xf32>,
    } else {
    }
    %c0 = arith.constant 0 : index
    %c0_1 = arith.constant 0 : index
    %3 = vector.load %arg9[%c0, %c0_1] : memref<32x128xf32, #tpu.memory_space<vmem>>, vector<32x128xf32>
    %c0_2 = arith.constant 0 : index
    %c0_3 = arith.constant 0 : index
    %4 = vector.load %arg3[%c0_2, %c0_3] : memref<32x128xf32, #tpu.memory_space<vmem>>, vector<32x128xf32>
    %c0_4 = arith.constant 0 : index
    %c0_5 = arith.constant 0 : index
    %5 = vector.load %arg4[%c0_4, %c0_5] : memref<128x128xf32, #tpu.memory_space<vmem>>, vector<128x128xf32>
    %cst = arith.constant dense<0.000000e+00> : vector<32x128xf32>
    %6 = tpu.matmul %4, %5, %cst {dimension_numbers = #tpu.dot_dimension_numbers<[1], [0], [0], [1], [0, 0, 1, 1], [], []>} : vector<32x128xf32>, vector<128x128xf32>, vector<32x128xf32> -> vector<32x128xf32>
    %7 = arith.addf %3, %6 : vector<32x128xf32>
    %c0_6 = arith.constant 0 : index
    %c0_7 = arith.constant 0 : index
    %8 = vector.load %arg9[%c0_6, %c0_7] : memref<32x128xf32, #tpu.memory_space<vmem>>, vector<32x128xf32>
    tpu.vector_store %arg9[%c0_6, %c0_7], %7 {strides = array<i32>} : memref<32x128xf32, #tpu.memory_space<vmem>>, vector<32x128xf32>,
    %c1_i32 = arith.constant 1 : i32
    %9 = arith.cmpi eq, %arg2, %c1_i32 : i32
    %10 = arith.extui %9 : i1 to i32
    %c0_i32_8 = arith.constant 0 : i32
    %11 = arith.cmpi ne, %10, %c0_i32_8 : i32
    scf.if %11 {
      %c0_9 = arith.constant 0 : index
      %c0_10 = arith.constant 0 : index
      %12 = vector.load %arg6[%c0_9, %c0_10] : memref<32x128xf32, #tpu.memory_space<vmem>>, vector<32x128xf32>
      %c0_11 = arith.constant 0 : index
      %c0_12 = arith.constant 0 : index
      %13 = vector.load %arg7[%c0_11, %c0_12] : memref<32x128xf32, #tpu.memory_space<vmem>>, vector<32x128xf32>
      %c0_13 = arith.constant 0 : index
      %c0_14 = arith.constant 0 : index
      %14 = vector.load %arg9[%c0_13, %c0_14] : memref<32x128xf32, #tpu.memory_space<vmem>>, vector<32x128xf32>
      %c0_15 = arith.constant 0 : index
      %c0_16 = arith.constant 0 : index
      %15 = vector.load %arg5[%c0_15, %c0_16] : memref<1x128xf32, #tpu.memory_space<vmem>>, vector<1x128xf32>
      %16 = vector.broadcast %15 : vector<1x128xf32> to vector<32x128xf32>
      %17 = arith.addf %14, %16 : vector<32x128xf32>
      %18 = arith.mulf %17, %12 : vector<32x128xf32>
      %c64_i32 = arith.constant 64 : i32
      %19 = tpu.dynamic_rotate %17 by %c64_i32 dim 1 : vector<32x128xf32>, i32 -> vector<32x128xf32>
      %20 = arith.mulf %19, %13 : vector<32x128xf32>
      %21 = arith.addf %18, %20 : vector<32x128xf32>
      %c0_17 = arith.constant 0 : index
      %c0_18 = arith.constant 0 : index
      %22 = vector.load %arg8[%c0_17, %c0_18] : memref<32x128xf32, #tpu.memory_space<vmem>>, vector<32x128xf32>
      tpu.vector_store %arg8[%c0_17, %c0_18], %21 {strides = array<i32>} : memref<32x128xf32, #tpu.memory_space<vmem>>, vector<32x128xf32>,
    } else {
    }
    return
  }
  func.func @transform_0(%arg0: i32, %arg1: i32, %arg2: i32) -> (i32, i32) {
    %c0_i32 = arith.constant 0 : i32
    return %arg0, %arg2 : i32, i32
  }
  func.func @transform_1(%arg0: i32, %arg1: i32, %arg2: i32) -> (i32, i32) {
    %c0_i32 = arith.constant 0 : i32
    return %arg2, %arg1 : i32, i32
  }
  func.func @transform_2(%arg0: i32, %arg1: i32, %arg2: i32) -> (i32, i32) {
    %c0_i32 = arith.constant 0 : i32
    %c0_i32_0 = arith.constant 0 : i32
    return %c0_i32, %arg1 : i32, i32
  }
  func.func @transform_3(%arg0: i32, %arg1: i32, %arg2: i32) -> (i32, i32) {
    %c0_i32 = arith.constant 0 : i32
    %c0_i32_0 = arith.constant 0 : i32
    return %arg0, %c0_i32 : i32, i32
  }
  func.func @transform_4(%arg0: i32, %arg1: i32, %arg2: i32) -> (i32, i32) {
    %c0_i32 = arith.constant 0 : i32
    %c0_i32_0 = arith.constant 0 : i32
    return %arg0, %c0_i32 : i32, i32
  }
  func.func @transform_5(%arg0: i32, %arg1: i32, %arg2: i32) -> (i32, i32) {
    %c0_i32 = arith.constant 0 : i32
    return %arg0, %arg1 : i32, i32
  }
}

</mosaic_0001>

<bundles_post_ra>
// kernel: tpu_custom_call.1
= control target key start
LH: loop header
LB: loop body
LE: loop exit
PB: predicated region body
PF: predicated region fallthrough
CT: control target
= control target key end

     0   :  { %s1965_s0 = inlined_call_operand.hbm [shape: f32[64,256], index: 0, kind: input, shape index: {}]   ;;  %s1966_s1 = inlined_call_operand.hbm [shape: f32[256,512], index: 1, kind: input, shape index: {}]   ;;  %s1967_s2 = inlined_call_operand.hbm [shape: f32[1,512], index: 2, kind: input, shape index: {}]   ;;  %s1968_s3 = inlined_call_operand.hbm [shape: f32[64,128], index: 3, kind: input, shape index: {}]   ;;  %s1969_s4 = inlined_call_operand.hbm [shape: f32[64,128], index: 4, kind: input, shape index: {}]   ;;  %s1970_s5 = inlined_call_operand.hbm [shape: f32[64,512], index: 5, kind: output, shape index: {}]  }
   0x1   :  { %2003 = sst [smem:[#allocation45_spill]] %s1965_s0 }
   0x2   :  { %2004 = sst [smem:[#allocation46_spill]] %s1966_s1 }
   0x3   :  { %2005 = sst [smem:[#allocation47_spill]] %s1967_s2 }
   0x4   :  { %2006 = sst [smem:[#allocation48_spill]] %s1968_s3 }
   0x5   :  { %2007 = sst [smem:[#allocation49_spill]] %s1969_s4 }
   0x6   :  { %2008 = sst [smem:[#allocation50_spill]] %s1970_s5 }
   0x7   :  { %10 = vsyncpa [#allocation4], 0 }
   0x8   :  { %12 = vsyncpa [#allocation4 + $0x1], 0 }
   0x9   :  { %13 = vsyncpa [#allocation7], 0 }
   0xa   :  { %15 = vsyncpa [#allocation7 + $0x1], 0 }
   0xb   :  { %16 = vsyncpa [#allocation10], 0 }
   0xc   :  { %18 = vsyncpa [#allocation10 + $0x1], 0 }
   0xd   :  { %19 = vsyncpa [#allocation5], 0 }
   0xe   :  { %21 = vsyncpa [#allocation5 + $0x1], 0  ;;  %s1465_s18 = smov 0   ;;  %s1467_s19 = smov 0  }
   0xf   :  { %s1469_s20 = smov 0   ;;  %s1471_s21 = smov 0  }
  0x10   :  { %s1473_s22 = smov 0   ;;  %s1475_s23 = smov 0  }
  0x11   :  { %s1477_s24 = smov 0   ;;  %s1479_s25 = smov 0  }
  0x12   :  { %s1481_s26 = smov 0   ;;  %s1483_s27 = smov 0  }
  0x13   :  { %s1485_s28 = smov 0   ;;  %s1487_s29 = smov 0  }
  0x14   :  { %s1489_s30 = smov 0   ;;  %s1491_s6 = smov 0  }
  0x15   :  { %s1493_s7 = smov 0   ;;  %s1495_s8 = smov 0  }
  0x16   :  { %s1497_s9 = smov 0   ;;  %s1499_s10 = smov 0  }
  0x17   :  { %s1501_s11 = smov 0   ;;  %s1503_s12 = smov 0  }
  0x18   :  { %s1505_s13 = smov 0   ;;  %s1507_s14 = smov 0  }
  0x19 LB: > { %2009 = sst [smem:[#allocation18_spill]] %s1340_s18  ;;  %s1574_s15 = sadd.s32 4294967295, %s1424_s14   ;;  %s1424_s14 = sphi %s1507_s14, %s27_s14   ;;  %s1420_s13 = sphi %s1505_s13, %s2116_s13   ;;  %s1416_s12 = sphi %s1503_s12, %s2115_s12   ;;  %s1412_s11 = sphi %s1501_s11, %s2114_s11   ;;  %s1408_s10 = sphi %s1499_s10, %s2113_s10   ;;  %s1404_s9 = sphi %s1497_s9, %s2112_s9   ;;  %s1400_s8 = sphi %s1495_s8, %s2111_s8   ;;  %s1396_s7 = sphi %s1493_s7, %s2110_s7   ;;  %s1392_s6 = sphi %s1491_s6, %s2109_s6   ;;  %s1388_s30 = sphi %s1489_s30, %s2098_s30   ;;  %s1384_s29 = sphi %s1487_s29, %s2097_s29   ;;  %s1380_s28 = sphi %s1485_s28, %s2096_s28   ;;  %s1376_s27 = sphi %s1483_s27, %s2095_s27   ;;  %s1372_s26 = sphi %s1481_s26, %s2108_s26   ;;  %s1368_s25 = sphi %s1479_s25, %s2094_s25   ;;  %s1364_s24 = sphi %s1477_s24, %s2093_s24   ;;  %s1360_s23 = sphi %s1475_s23, %s2092_s23   ;;  %s1356_s22 = sphi %s1473_s22, %s2105_s22   ;;  %s1352_s21 = sphi %s1471_s21, %s2103_s21   ;;  %s1348_s20 = sphi %s1469_s20, %s2090_s20   ;;  %s1344_s19 = sphi %s1467_s19, %s2089_s19   ;;  %s1340_s18 = sphi %s1465_s18, %s2088_s18  }
  0x1a   : > { %2010 = sst [smem:[#allocation19_spill]] %s1344_s19  ;;  %s39_s16 = sadd.s32 1, %s1412_s11 }
  0x1b   : > { %2011 = sst [smem:[#allocation20_spill]] %s1348_s20  ;;  %p40_p0 = scmp.ge.s32.totalorder %s39_s16, 2 }
  0x1c   : > { %2012 = sst [smem:[#allocation21_spill]] %s1360_s23  ;;  %s42_s17 = sadd.s32 1, %s1416_s12 }
  0x1d   : > { %2013 = sst [smem:[#allocation22_spill]] %s1364_s24  ;;  %p1987_p1 = scmp.eq.s32.totalorder %s1424_s14, 0 }
  0x1e   : > { %2014 = sst [smem:[#allocation23_spill]] %s1368_s25  ;;  %p1985_p2 = scmp.eq.s32.totalorder %s1574_s15, 0 }
  0x1f   : > { %2015 = sst [smem:[#allocation24_spill]] %s1372_s26  ;;  %s2118_s16 = smov (%p40_p0, %s39_s16), 0 }
  0x20   : > { %2016 = sst [smem:[#allocation25_spill]] %s1380_s28  ;;  %s2120_s17 = smov (!%p40_p0, %s42_s17), %s1416_s12 }
  0x21   : > { %2017 = sst [smem:[#allocation26_spill]] %s1384_s29  ;;  %s1587_s5 = ssub.s32 %s1412_s11, %s2118_s16 }
  0x22   : > { %2018 = sst [smem:[#allocation27_spill]] %s1388_s30  ;;  %p44_p3 = scmp.ge.s32.totalorder %s2120_s17, 4 }
  0x23   : > { %2019 = sst [smem:[#allocation28_spill]] %s1392_s6  ;;  %p90_p4 = scmp.ne.s32.totalorder %s1384_s29, %s1380_s28 }
  0x24   : > { %2020 = sst [smem:[#allocation29_spill]] %s1396_s7  ;;  %p96_p5 = scmp.ne.s32.totalorder %s1380_s28, %s1376_s27 }
  0x25   : > { %2021 = sst [smem:[#allocation30_spill]] %s1400_s8  ;;  %p200_p6 = scmp.eq.s32.totalorder %s1574_s15, 15 }
  0x26   : > { %2022 = sst [smem:[#allocation31_spill]] %s1404_s9  ;;  %s83_s9 = sadd.s32 1, %s1384_s29 }
  0x27   : > { %2023 = sst [smem:[#allocation32_spill]] %s1408_s10  ;;  %p1602_p7 = por %p90_p4, %p1987_p1 }
  0x28   : > { %2024 = sst [smem:[#allocation33_spill]] %s1420_s13  ;;  %p1608_p8 = por %p96_p5, %p1985_p2 }
  0x29   : > { %2025 = sst [smem:[#allocation34_spill]] %s2118_s16  ;;  %p2002_p9 = scmp.lt.s32.totalorder %s1424_s14, 16 }
  0x2a   : > { %s1598_s10 = scalar_select %p44_p3, 0, %s2120_s17  }
  0x2b   : > { %s2028_s16 = scalar_select %p1608_p8, 1, 0 }
  0x2c   : > { %2026 = sst [smem:[#allocation35_spill]] %s1598_s10  ;;  %s1614_s2 = ssub.s32 %s1416_s12, %s1598_s10 }
  0x2d   : > { %2029 = sst [smem:[#allocation36_spill]] %s2028_s16  ;;  %s80_s27 = sor.u32 %s1614_s2, %s1587_s5 }
  0x2e   : > { %p81_p10 = scmp.eq.s32.totalorder %s80_s27, 0  ;;  %s1986_s28 = sand.u32 1, %s1424_s14  }
  0x2f   : > { %s252_s24 = sand.u32 1, %s1384_s29   ;;  %s780_s26 = sshll.u32 %s1412_s11, 6 }
  0x30   : > { %s1621_s0 = scalar_select %p81_p10, %s1384_s29, %s83_s9  }
  0x31   : > { %s755_s25 = sshll.u32 %s252_s24, 7  ;;  %s259_s4 = sadd.s32 %s1416_s12, %s780_s26 }
  0x32   : > { %2030 = sst [smem:[#allocation37_spill]] %s1621_s0  ;;  %s758_s30 = sshll.u32 %s259_s4, 3 }
  0x33   : > { %s254_s10 = scalar_lea.vmem [#allocation6], %s755_s25  ;;  %s2031_s1 = sld [smem:[#allocation46_spill]] }
  0x34   : > { %s264_s16 = sshll.u32 %s254_s10, 4  ;;  %p848_p11 = pnand %p2002_p9, %p1602_p7  ;;  %s265_s16 = int_to_ptr.vmem [resolvable:$true] %s264_s16 }
  0x35   : > { %p765_p12 = scmp.ge.s32.totalorder %s1424_s14, 1  ;;  %s1636_s4 = scalar_lea.sflag [#allocation7], %s1986_s28 }
  0x36   : > { %s1426_s24 = smov 512   ;;  %s1981_s25 = smov 128  }
  0x37   : > { %s1983_s26 = smov 8   ;;  %p333_p13 = scmp.lt.s32.totalorder %s1424_s14, 17 }
  0x38   : > { %s748_s6 = sadd.s32 4294967294, %s1424_s14   ;;  %s46_s7 = sadd.s32 1, %s1420_s13 }
  0x39   : > { %s261_s27 = scalar_lea.hbm %s2031_s1, %s758_s30  ;;  %p1642_p0 = pnand %p765_p12, %p333_p13 }
  0x3a   : > { %s262_s9 = sshll.u32 %s261_s27, 4  ;;  %s2122_s7 = smov (!%p44_p3, %s46_s7), %s1420_s13  ;;  %s263_s9 = int_to_ptr.hbm [resolvable:$true] %s262_s9 }
  0x3b   : > { %850 = dma.hbm_to_vmem [thread:$0]  (!%p848_p11), %s263_s9, 2048, %s265_s16, %s1636_s4, %s1426_s24, %s1981_s25, %s1983_s26  }
  0x3c   : > { %s135_s8 = sadd.s32 1, %s1360_s23  ;;  %p142_p4 = scmp.ne.s32.totalorder %s1360_s23, %s1356_s22 }
  0x3d   : > { %p48_p5 = scmp.ge.s32.totalorder %s2122_s7, 2  ;;  %p148_p7 = scmp.ne.s32.totalorder %s1356_s22, %s1352_s21 }
  0x3e   : > { %p1658_p10 = por %p142_p4, %p1987_p1  ;;  %s189_s16 = sadd.s32 1, %s1348_s20 }
  0x3f   : > { %s2124_s7 = smov (%p48_p5, %s2122_s7), 0  ;;  %p1667_p11 = por %p148_p7, %p1985_p2 }
  0x40   : > { %2034 = sst [smem:[#allocation38_spill]] %s2124_s7  ;;  %p199_p3 = scmp.ne.s32.totalorder %s1348_s20, %s1344_s19 }
  0x41   : > { %s2035_s17 = scalar_select %p1667_p11, 1, 0 }
  0x42   : > { %s50_s27 = ssub.s32 %s1420_s13, %s2124_s7  ;;  %p205_p12 = scmp.ne.s32.totalorder %s1344_s19, %s1340_s18 }
  0x43   : > { %2036 = sst [smem:[#allocation39_spill]] %s2035_s17  ;;  %s52_s21 = sor.u32 %s1587_s5, %s50_s27 }
  0x44   : > { %p133_p13 = scmp.eq.s32.totalorder %s50_s27, 0  ;;  %p1678_p4 = scmp.eq.s32.totalorder %s52_s21, 0 }
  0x45   : > { %s186_s24 = sor.u32 %s1614_s2, %s50_s27  ;;  %p1688_p7 = por %p200_p6, %p199_p3 }
  0x46   : > { %s1684_s25 = scalar_select %p133_p13, %s1360_s23, %s135_s8  }
  0x47   : > { %p187_p5 = scmp.eq.s32.totalorder %s186_s24, 0  ;;  %p206_p2 = scmp.eq.s32.totalorder %s748_s6, 15 }
  0x48   : > { %2038 = sst [smem:[#allocation40_spill]] %s1684_s25  ;;  %s293_s21 = sand.u32 1, %s1360_s23  }
  0x49   : > { %s2039_s26 = scalar_select %p1688_p7, 1, 0 }
  0x4a   : > { %s1693_s28 = scalar_select %p187_p5, %s1348_s20, %s189_s16  }
  0x4b   : > { %2040 = sst [smem:[#allocation41_spill]] %s2039_s26  ;;  %p1695_p1 = por %p206_p2, %p205_p12 }
  0x4c   : > { %2041 = sst [smem:[#allocation42_spill]] %s1693_s28  ;;  %s759_s27 = sshll.u32 %s293_s21, 5 }
  0x4d   : > { %s2042_s5 = scalar_select %p1695_p1, 1, 0 }
  0x4e   : > { %s781_s1 = sshll.u32 %s1420_s13, 5  ;;  %s2044_s3 = sld [smem:[#allocation48_spill]] }
  0x4f   : > { %2043 = sst [smem:[#allocation43_spill]] %s2042_s5  ;;  %s295_s6 = scalar_lea.vmem [#allocation9], %s759_s27 }
  0x50   : > { %s2045_s24 = sld [smem:[#allocation29_spill]]  ;;  %s303_s16 = sshll.u32 %s295_s6, 4  ;;  %s304_s16 = int_to_ptr.vmem [resolvable:$true] %s303_s16 }
  0x51   : > { %s2046_s29 = sld [smem:[#allocation28_spill]]  ;;  %p1708_p2 = pnand %p2002_p9, %p1658_p10 }
  0x52   : > { %s2047_s28 = sld [smem:[#allocation27_spill]]  ;;  %s317_s23 = scalar_lea.vmem [#allocation11], %s759_s27 }
  0x53   : > { %s1715_s6 = sshll.u32 %s317_s23, 4  ;;  %s2051_s5 = sand.u32 1, %s1424_s14  }
  0x54   : > { %s300_s0 = scalar_lea.hbm %s2044_s3, %s781_s1  ;;  %2050 = sst [smem:[#allocation27_spill]] %s1715_s6 }
  0x55   : > { %s301_s25 = sshll.u32 %s300_s0, 4  ;;  %s2049_s0 = sld [smem:[#allocation49_spill]]  ;;  %s302_s25 = int_to_ptr.hbm [resolvable:$true] %s301_s25 }
  0x56   : > { %s1719_s10 = scalar_lea.sflag [#allocation10], %s2051_s5  ;;  %s2052_s18 = smov 8  }
  0x57   : > { %s2053_s26 = smov 128   ;;  %s55_s21 = sadd.s32 1, %s2045_s24 }
  0x58   : > { %856 = dma.hbm_to_vmem [thread:$0]  (!%p1708_p2), %s302_s25, 512, %s304_s16, %s1719_s10, %s2053_s26, %s2053_s26, %s2052_s18  }
  0x59   : > { %p62_p6 = scmp.ne.s32.totalorder %s2045_s24, %s2046_s29  ;;  %p2055_p10 = scmp.eq.s32.totalorder %s1424_s14, 0 }
  0x5a   : > { %p68_p12 = scmp.ne.s32.totalorder %s2046_s29, %s2047_s28  ;;  %s226_s23 = sand.u32 1, %s2045_s24  }
  0x5b   : > { %s322_s3 = scalar_lea.hbm %s2049_s0, %s781_s1  ;;  %p1740_p3 = por %p2055_p10, %p62_p6 }
  0x5c   : > { %s323_s20 = sshll.u32 %s322_s3, 4  ;;  %s779_s5 = sshll.u32 %s1420_s13, 3  ;;  %s1727_s20 = int_to_ptr.hbm [resolvable:$true] %s323_s20 }
  0x5d   : > { %s1736_s1 = scalar_select %p1678_p4, %s2045_s24, %s55_s21  }
  0x5e   : > { %p2057_p13 = scmp.eq.s32.totalorder %s1574_s15, 0  ;;  %s2058_s25 = sld [smem:[#allocation24_spill]] }
  0x5f   : > { %2054 = sst [smem:[#allocation44_spill]] %s1736_s1  ;;  %s751_s16 = sshll.u32 %s226_s23, 5 }
  0x60   : > { %p1750_p5 = por %p2057_p13, %p68_p12  ;;  %s2060_s9 = sld [smem:[#allocation23_spill]] }
  0x61   : > { %s2061_s8 = sld [smem:[#allocation22_spill]]  ;;  %s235_s0 = sadd.s32 %s1412_s11, %s779_s5 }
  0x62   : > { %s754_s21 = sshll.u32 %s235_s0, 3  ;;  %s2062_s28 = sld [smem:[#allocation45_spill]] }
  0x63   : > { %s230_s24 = scalar_lea.vmem [#allocation3], %s751_s16  ;;  %p845_p4 = pnand %p2002_p9, %p1740_p3 }
  0x64   : > { %s240_s13 = sshll.u32 %s230_s24, 4  ;;  %s227_s17 = scalar_lea.sflag [#allocation4], %s226_s23  ;;  %s241_s13 = int_to_ptr.vmem [resolvable:$true] %s240_s13 }
  0x65   : > { %s1429_s5 = smov 256   ;;  %s2063_s6 = sld [smem:[#allocation27_spill]] }
  0x66   : > { %p107_p6 = scmp.eq.s32.totalorder %s1614_s2, 0  ;;  %s109_s1 = sadd.s32 1, %s2058_s25 }
  0x67   : > { %p116_p10 = scmp.ne.s32.totalorder %s2058_s25, %s2060_s9  ;;  %p122_p12 = scmp.ne.s32.totalorder %s2060_s9, %s2061_s8 }
  0x68   : > { %s237_s29 = scalar_lea.hbm %s2062_s28, %s754_s21  ;;  %p2064_p13 = scmp.eq.s32.totalorder %s1424_s14, 0 }
  0x69   : > { %s238_s19 = sshll.u32 %s237_s29, 4  ;;  %p2065_p3 = scmp.eq.s32.totalorder %s1574_s15, 0  ;;  %s239_s19 = int_to_ptr.hbm [resolvable:$true] %s238_s19 }
  0x6a   : > { %847 = dma.hbm_to_vmem [thread:$0]  (!%p845_p4), %s239_s19, 512, %s241_s13, %s227_s17, %s1429_s5, %s2053_s26, %s2052_s18  }
  0x6b   : > { %s1771_s16 = scalar_select %p107_p6, %s2058_s25, %s109_s1  }
  0x6c   : > { %p118_p1 = por %p116_p10, %p2064_p13  ;;  %p1777_p9 = por %p122_p12, %p2065_p3 }
  0x6d   : > { %s276_s23 = sand.u32 1, %s2058_s25   ;;  %s2067_s17 = sld [smem:[#allocation47_spill]] }
  0x6e   : > { %s277_s2 = scalar_lea.vmem [#allocation8], %s276_s23  ;;  %p2068_p4 = scmp.lt.s32.totalorder %s1424_s14, 16 }
  0x6f   : > { %s284_s28 = sshll.u32 %s277_s2, 4  ;;  %s2069_s9 = int_to_ptr.vmem [resolvable:$true] %s2063_s6  ;;  %s285_s28 = int_to_ptr.vmem [resolvable:$true] %s284_s28 }
  0x70   : > { %p851_p6 = pnand %p2068_p4, %p118_p1  ;;  %s2070_s25 = sld [smem:[#allocation28_spill]] (!%p1642_p0) }
  0x71   : > { %859 = dma.hbm_to_vmem [thread:$0]  (!%p1708_p2), %s1727_s20, 512, %s2069_s9, %s1719_s10, %s2053_s26, %s2053_s26, %s2052_s18  }
  0x72   : > { %337 = sbr.rel (%p1642_p0) target bundleno = 493 (0x1ed), region = 40 }
  0x73   : > { %s280_s0 = scalar_lea.hbm %s2067_s17, %s1416_s12 }
  0x74   : > { %s282_s21 = sshll.u32 %s280_s0, 4  ;;  %s283_s21 = int_to_ptr.hbm [resolvable:$true] %s282_s21 }
  0x75   : > { %853 = dma.hbm_to_vmem [thread:$0]  (!%p851_p6), %s283_s21, 16, %s285_s28, %s1636_s4  }
  0x76   : > { %s339_s8 = sand.u32 (!%p1642_p0), 1, %s2070_s25  }
  0x77   : > { %s766_s29 = sshll.u32 %s339_s8, 5  ;;  %s340_s24 = scalar_lea.sflag [#allocation4], %s339_s8 }
  0x78   : > { %s1801_s5 = scalar_lea.vmem [#allocation3], %s766_s29 }
  0x79   : > { %1319 = dma.done.wait (%p1750_p5), %s340_s24, 512  }
  0x7a   : > { %1321 = vsyncadd (%p1750_p5), %s340_s24, 4294966784  ;;  %s2071_s7 = sld [smem:[#allocation25_spill]]  ;;  %s349_s18 = sand.u32 1, %s1574_s15  }
  0x7b   : > { %s350_s26 = scalar_lea.sflag [#allocation7], %s349_s18 }
  0x80   : > { %s351_s20 = sand.u32 1, %s2071_s7  }
  0x81   : > { %s767_s4 = sshll.u32 %s351_s20, 7 }
  0x82   : > { %s1809_s30 = scalar_lea.vmem [#allocation6], %s767_s4 }
  0x83   : > { %1323 = dma.done.wait (%p1608_p8), %s350_s26, 2048  }
  0x84   : > { %1325 = vsyncadd (%p1608_p8), %s350_s26, 4294965248  ;;  %s2073_s10 = sld [smem:[#allocation23_spill]] }
  0x8a   : > { %s361_s1 = sand.u32 1, %s2073_s10  }
  0x8b   : > { %s1816_s23 = scalar_lea.vmem [#allocation8], %s361_s1 }
  0x8c   : > { %1327 = dma.done.wait (%p1777_p9), %s350_s26, 16  }
  0x8d   : > { %1329 = vsyncadd (%p1777_p9), %s350_s26, 4294967280  ;;  %s370_s27 = sand.u32 1, %s1356_s22   ;;  %s369_s13 = scalar_lea.sflag [#allocation10], %s349_s18 }
  0x8e   : > { %s768_s19 = sshll.u32 %s370_s27, 5 }
  0x8f   : > { %s1823_s17 = scalar_lea.vmem [#allocation9], %s768_s19 }
  0x90   : > { %1331 = dma.done.wait (%p1667_p11), %s369_s13, 1024  }
  0x91   : > { %1333 = vsyncadd (%p1667_p11), %s369_s13, 4294966272  ;;  %s2075_s0 = sld [smem:[#allocation19_spill]]  ;;  %s1832_s28 = scalar_lea.vmem [#allocation11], %s768_s19 }
  0x92   : > { %s2076_s9 = sld [smem:[#allocation30_spill]] }
  0x97   : > { %s426_s21 = sand.u32 1, %s2075_s0  }
  0x98   : > { %s770_s2 = sshll.u32 %s426_s21, 5  ;;  %p771_p1 = scmp.ne.s32.totalorder %s2076_s9, 0 }
  0x99   : > { %s1834_s3 = scalar_lea.vmem [#allocation12], %s770_s2 }
  0x9a   : > { %437 = sbr.rel (%p771_p1) target bundleno = 164 (0xa4), region = 64 }
  0x9f   : > { %v1430_v0 = vmov 0.0  }
  0xa0   : > { %438 = vst [vmem:[#allocation2 + $0x10] sm:$0xff] %v1430_v0 }
  0xa1   : > { %439 = vst [vmem:[#allocation2] sm:$0xff] %v1430_v0 }
  0xa2   : > { %440 = vst [vmem:[#allocation2 + $0x18] sm:$0xff] %v1430_v0 }
  0xa3   : > { %441 = vst [vmem:[#allocation2 + $0x8] sm:$0xff] %v1430_v0 }
  0xa4 PF: > { %v465_v1 = vld [vmem:[%s1809_s30 + $0x78] sm:$0xff]  ;;  %v464_v2 = vld [vmem:[%s1809_s30 + $0x70] sm:$0xff]  ;;  %v463_v3 = vld [vmem:[%s1809_s30 + $0x68] sm:$0xff]  ;;  %s2077_s25 = sld [smem:[#allocation30_spill]] }
  0xa5   : > { %785 = vmatpush.msra.mxu2 %v465_v1  ;;  %786 = vmatpush.msra.mxu3 %v465_v1  ;;  %v462_v4 = vld [vmem:[%s1809_s30 + $0x60] sm:$0xff]  ;;  %v461_v5 = vld [vmem:[%s1809_s30 + $0x58] sm:$0xff]  ;;  %v460_v6 = vld [vmem:[%s1809_s30 + $0x50] sm:$0xff] }
  0xa6   : > { %466 = vmatpush.msra.mxu0 %v465_v1  ;;  %784 = vmatpush.msra.mxu1 %v465_v1  ;;  %v459_v7 = vld [vmem:[%s1809_s30 + $0x48] sm:$0xff]  ;;  %v458_v8 = vld [vmem:[%s1809_s30 + $0x40] sm:$0xff]  ;;  %v457_v9 = vld [vmem:[%s1809_s30 + $0x38] sm:$0xff] }
  0xa7   : > { %788 = vmatpush.msra.mxu2 %v464_v2  ;;  %789 = vmatpush.msra.mxu3 %v464_v2  ;;  %v456_v10 = vld [vmem:[%s1809_s30 + $0x30] sm:$0xff]  ;;  %v455_v11 = vld [vmem:[%s1809_s30 + $0x28] sm:$0xff]  ;;  %v454_v12 = vld [vmem:[%s1809_s30 + $0x20] sm:$0xff] }
  0xa8   : > { %467 = vmatpush.msra.mxu0 %v464_v2  ;;  %787 = vmatpush.msra.mxu1 %v464_v2  ;;  %v453_v13 = vld [vmem:[%s1809_s30 + $0x18] sm:$0xff]  ;;  %v452_v14 = vld [vmem:[%s1809_s30 + $0x10] sm:$0xff]  ;;  %v451_v15 = vld [vmem:[%s1809_s30 + $0x8] sm:$0xff] }
  0xa9   : > { %791 = vmatpush.msra.mxu2 %v463_v3  ;;  %792 = vmatpush.msra.mxu3 %v463_v3  ;;  %v450_v16 = vld [vmem:[%s1809_s30] sm:$0xff]  ;;  %v448_v17 = vld [vmem:[%s1801_s5 + $0x10] sm:$0xff]  ;;  %v449_v18 = vld [vmem:[%s1801_s5 + $0x18] sm:$0xff] }
  0xaa   : > { %468 = vmatpush.msra.mxu0 %v463_v3  ;;  %790 = vmatpush.msra.mxu1 %v463_v3  ;;  %v446_v19 = vld [vmem:[%s1801_s5] sm:$0xff]  ;;  %v447_v20 = vld [vmem:[%s1801_s5 + $0x8] sm:$0xff]  ;;  %v442_v21 = vld [vmem:[#allocation2 + $0x10] sm:$0xff]  ;;  %p772_p8 = scmp.ne.s32.totalorder %s2077_s25, 1 }
  0xab   : > { %794 = vmatpush.msra.mxu2 %v462_v4  ;;  %795 = vmatpush.msra.mxu3 %v462_v4  ;;  %v443_v22 = vld [vmem:[#allocation2] sm:$0xff]  ;;  %v444_v27 = vld [vmem:[#allocation2 + $0x18] sm:$0xff]  ;;  %v445_v28 = vld [vmem:[#allocation2 + $0x8] sm:$0xff]  ;;  %s1431_s8 = smov (!%p772_p8), 64  }
  0xac   : > { %469 = vmatpush.msra.mxu0 %v462_v4  ;;  %793 = vmatpush.msra.mxu1 %v462_v4 }
  0xad   : > { %797 = vmatpush.msra.mxu2 %v461_v5  ;;  %798 = vmatpush.msra.mxu3 %v461_v5 }
  0xae   : > { %470 = vmatpush.msra.mxu0 %v461_v5  ;;  %796 = vmatpush.msra.mxu1 %v461_v5 }
  0xaf   : > { %800 = vmatpush.msra.mxu2 %v460_v6  ;;  %801 = vmatpush.msra.mxu3 %v460_v6 }
  0xb0   : > { %471 = vmatpush.msra.mxu0 %v460_v6  ;;  %799 = vmatpush.msra.mxu1 %v460_v6 }
  0xb1   : > { %803 = vmatpush.msra.mxu2 %v459_v7  ;;  %804 = vmatpush.msra.mxu3 %v459_v7 }
  0xb2   : > { %472 = vmatpush.msra.mxu0 %v459_v7  ;;  %802 = vmatpush.msra.mxu1 %v459_v7 }
  0xb3   : > { %806 = vmatpush.msra.mxu2 %v458_v8  ;;  %807 = vmatpush.msra.mxu3 %v458_v8 }
  0xb4   : > { %473 = vmatpush.msra.mxu0 %v458_v8  ;;  %805 = vmatpush.msra.mxu1 %v458_v8 }
  0xb5   : > { %809 = vmatpush.msra.mxu2 %v457_v9  ;;  %810 = vmatpush.msra.mxu3 %v457_v9 }
  0xb6   : > { %474 = vmatpush.msra.mxu0 %v457_v9  ;;  %808 = vmatpush.msra.mxu1 %v457_v9 }
  0xb7   : > { %812 = vmatpush.msra.mxu2 %v456_v10  ;;  %813 = vmatpush.msra.mxu3 %v456_v10 }
  0xb8   : > { %475 = vmatpush.msra.mxu0 %v456_v10  ;;  %811 = vmatpush.msra.mxu1 %v456_v10 }
  0xb9   : > { %815 = vmatpush.msra.mxu2 %v455_v11  ;;  %816 = vmatpush.msra.mxu3 %v455_v11 }
  0xba   : > { %476 = vmatpush.msra.mxu0 %v455_v11  ;;  %814 = vmatpush.msra.mxu1 %v455_v11 }
  0xbb   : > { %818 = vmatpush.msra.mxu2 %v454_v12  ;;  %819 = vmatpush.msra.mxu3 %v454_v12 }
  0xbc   : > { %477 = vmatpush.msra.mxu0 %v454_v12  ;;  %817 = vmatpush.msra.mxu1 %v454_v12 }
  0xbd   : > { %821 = vmatpush.msra.mxu2 %v453_v13  ;;  %822 = vmatpush.msra.mxu3 %v453_v13 }
  0xbe   : > { %478 = vmatpush.msra.mxu0 %v453_v13  ;;  %820 = vmatpush.msra.mxu1 %v453_v13 }
  0xbf   : > { %824 = vmatpush.msra.mxu2 %v452_v14  ;;  %825 = vmatpush.msra.mxu3 %v452_v14 }
  0xc0   : > { %479 = vmatpush.msra.mxu0 %v452_v14  ;;  %823 = vmatpush.msra.mxu1 %v452_v14 }
  0xc1   : > { %827 = vmatpush.msra.mxu2 %v451_v15  ;;  %828 = vmatpush.msra.mxu3 %v451_v15 }
  0xc2   : > { %480 = vmatpush.msra.mxu0 %v451_v15  ;;  %826 = vmatpush.msra.mxu1 %v451_v15 }
  0xc3   : > { %830 = vmatpush.msra.mxu2 %v450_v16  ;;  %831 = vmatpush.msra.mxu3 %v450_v16 }
  0xc4   : > { %488 = vmatmul.f32.vlgmr.msra.gmra.mxu2 %v448_v17  ;;  %491 = vmatmul.f32.vlgmr.msra.gmra.mxu3 %v449_v18 }
  0xc5   : > { %481 = vmatpush.msra.mxu0 %v450_v16  ;;  %829 = vmatpush.msra.mxu1 %v450_v16 }
  0xc6   : > { %482 = vmatmul.f32.vlgmr.msra.gmra.mxu0 %v446_v19  ;;  %485 = vmatmul.f32.vlgmr.msra.gmra.mxu1 %v447_v20 }
 0x143   : > { %v483_v23 = vpop.f32.mrf.mxu0  ;;  %v486_v24 = vpop.f32.mrf.mxu1 }
 0x144   : > { %v495_v25 = vadd.f32 %v483_v23, %v442_v21  ;;  %v496_v26 = vadd.f32 %v486_v24, %v443_v22 }
 0x146   : > { %499 = vst [vmem:[#allocation2 + $0x10] sm:$0xff] %v495_v25 }
 0x147   : > { %500 = vst [vmem:[#allocation2] sm:$0xff] %v496_v26  ;;  %v489_v29 = vpop.f32.mrf.mxu2  ;;  %v492_v30 = vpop.f32.mrf.mxu3  ;;  %506 = sbr.rel (%p772_p8) target bundleno = 468 (0x1d4), region = 68 }
 0x148   : > { %v497_v31 = vadd.f32 %v489_v29, %v444_v27  ;;  %v498_v32 = vadd.f32 %v492_v30, %v445_v28 }
 0x14a   : > { %501 = vst [vmem:[#allocation2 + $0x18] sm:$0xff] %v497_v31 }
 0x14b   : > { %502 = vst [vmem:[#allocation2 + $0x8] sm:$0xff] %v498_v32 }
 0x14c   : > { %v1051_v34 = vld [vmem:[%s1816_s23] ss:$0 sm:$0xff]  ;;  %v509_v42 = vld [vmem:[%s1823_s17 + $0x10] sm:$0xff]  ;;  %v507_v43 = vld [vmem:[%s1823_s17] sm:$0xff] }
 0x14d   : > { %v515_v35 = vld [vmem:[#allocation2 + $0x10] sm:$0xff]  ;;  %v511_v45 = vld [vmem:[%s1832_s28] sm:$0xff]  ;;  %v510_v54 = vld [vmem:[%s1823_s17 + $0x18] sm:$0xff] }
 0x14e   : > { %v523_v37 = vadd.f32 %v1051_v34, %v515_v35  ;;  %v516_v39 = vld [vmem:[#allocation2] sm:$0xff]  ;;  %v513_v44 = vld [vmem:[%s1832_s28 + $0x10] sm:$0xff]  ;;  %v508_v55 = vld [vmem:[%s1823_s17 + $0x8] sm:$0xff] }
 0x14f   : > { %v524_v41 = vadd.f32 %v1051_v34, %v516_v39  ;;  %v514_v56 = vld [vmem:[%s1832_s28 + $0x18] sm:$0xff]  ;;  %v512_v57 = vld [vmem:[%s1832_s28 + $0x8] sm:$0xff] }
 0x150   : > { %531 = vrot.lane.b32.xlu0 %v523_v37, %s1431_s8  ;;  %v527_v47 = vmul.f32 %v523_v37, %v507_v43 }
 0x151   : > { %v517_v33 = vld [vmem:[#allocation2 + $0x18] sm:$0xff]  ;;  %v528_v59 = vmul.f32 %v524_v41, %v508_v55 }
 0x152   : > { %v525_v36 = vadd.f32 %v1051_v34, %v517_v33  ;;  %v518_v38 = vld [vmem:[#allocation2 + $0x8] sm:$0xff] }
 0x153   : > { %v526_v40 = vadd.f32 %v1051_v34, %v518_v38 }
 0x154   : > { %535 = vrot.lane.b32.xlu1 %v525_v36, %s1431_s8  ;;  %v529_v46 = vmul.f32 %v525_v36, %v509_v42 }
 0x155   : > { %v530_v58 = vmul.f32 %v526_v40, %v510_v54 }
 0x158   : > { %533 = vrot.lane.b32.xlu0 %v524_v41, %s1431_s8 }
 0x15c   : > { %537 = vrot.lane.b32.xlu1 %v526_v40, %s1431_s8 }
 0x1c2   : > { %v532_v49 = vpop.permute.xlu0 %531 }
 0x1c3   : > { %v539_v51 = vmul.f32 %v532_v49, %v511_v45 }
 0x1c5   : > { %v543_v53 = vadd.f32 %v539_v51, %v527_v47 }
 0x1c6   : > { %v536_v48 = vpop.permute.xlu1 %535 }
 0x1c7   : > { %v541_v50 = vmul.f32 %v536_v48, %v513_v44  ;;  %547 = vst [vmem:[%s1834_s3] sm:$0xff] %v543_v53 }
 0x1c9   : > { %v545_v52 = vadd.f32 %v541_v50, %v529_v46 }
 0x1ca   : > { %v534_v61 = vpop.permute.xlu0 %533 }
 0x1cb   : > { %549 = vst [vmem:[%s1834_s3 + $0x10] sm:$0xff] %v545_v52  ;;  %v540_v63 = vmul.f32 %v534_v61, %v512_v57 }
 0x1cd   : > { %v544_v1 = vadd.f32 %v540_v63, %v528_v59 }
 0x1ce   : > { %v538_v60 = vpop.permute.xlu1 %537 }
 0x1cf   : > { %v542_v62 = vmul.f32 %v538_v60, %v514_v56  ;;  %548 = vst [vmem:[%s1834_s3 + $0x8] sm:$0xff] %v544_v1 }
 0x1d1   : > { %v546_v0 = vadd.f32 %v542_v62, %v530_v58 }
 0x1d3   : > { %550 = vst [vmem:[%s1834_s3 + $0x18] sm:$0xff] %v546_v0 }
 0x1d4 PF: > { %s2078_s29 = sld [smem:[#allocation32_spill]]  ;;  %s566_s20 = sshll.u32 %s1834_s3, 4  ;;  %s567_s20 = int_to_ptr.vmem [resolvable:$true] %s566_s20 }
 0x1d5   : > { %s2079_s24 = sld [smem:[#allocation31_spill]]  ;;  %s552_s27 = scalar_lea.sflag [#allocation5], %s426_s21 }
 0x1d6   : > { %s2082_s10 = sld [smem:[#allocation50_spill]] }
 0x1da   : > { %s783_s6 = sshll.u32 %s2078_s29, 4 }
 0x1db   : > { %s563_s18 = sadd.s32 %s2079_s24, %s783_s6 }
 0x1dc   : > { %s776_s4 = sshll.u32 %s563_s18, 3  ;;  %s2083_s1 = smov %s2082_s10 }
 0x1dd   : > { %s565_s23 = scalar_lea.hbm %s2082_s10, %s776_s4  ;;  %s1222_s2 = scalar_lea.hbm %s2083_s1, 256 }
 0x1de   : > { %s568_s15 = sshll.u32 %s565_s23, 4  ;;  %s569_s15 = int_to_ptr.hbm [resolvable:$true] %s568_s15 }
 0x1df   : > { %s1216_s19 = sshra.s32 %s569_s15, 4  ;;  %s1217_s19 = int_to_ptr.hbm [resolvable:$true] %s1216_s19 }
 0x1e0   : > { %s1218_s13 = scalar_lea.hbm %s1217_s19, 32  ;;  %p1223_p2 = scmp.lt.s32.totalorder %s1217_s19, %s2083_s1 }
 0x1e1   : > { %p1219_p9 = scmp.ne.s32.totalorder %s1217_s19, %s1218_s13  ;;  %p1224_p5 = scmp.lt.s32.totalorder %s1222_s2, %s1218_s13 }
 0x1e3   : > { %p1220_p0 = pnand %p1219_p9, %p1688_p7  ;;  %p1225_p10 = por %p1224_p5, %p1223_p2 }
 0x1e5   : > { %p1221_p11 = pneg %p1220_p0 }
 0x1e7   : > { %p1226_p12 = pnand %p1225_p10, %p1221_p11 }
 0x1e9   : > { %1229 = shalt.err (!%p1226_p12)
}
 0x1ea   : > { %s1432_s21 = smov 128   ;;  %s1433_s9 = smov 512  }
 0x1eb   : > { %s1434_s25 = smov 8  }
 0x1ec   : > { %842 = dma.vmem_to_hbm [thread:$0]  (%p1688_p7), %s567_s20, 512, %s569_s15, %s552_s27, %s1432_s21, %s1433_s9, %s1434_s25  }
 0x1ed PF: > { %s2084_s8 = sld [smem:[#allocation18_spill]]  ;;  %p865_p13 = scmp.ge.s32.totalorder %s1424_s14, 2 }
 0x1ee   : > { %s2085_s29 = sld [smem:[#allocation43_spill]] }
 0x1f3   : > { %s583_s24 = sand.u32 1, %s2084_s8  }
 0x1f4   : > { %p2086_p3 = scmp.ne.s32.totalorder %s2085_s29, 0  ;;  %s584_s5 = scalar_lea.sflag [#allocation5], %s583_s24 }
 0x1f6   : > { %p861_p4 = pnand %p865_p13, %p2086_p3 }
 0x1f8   : > { %p862_p6 = pneg %p861_p4 }
 0x1fa   : > { %1335 = dma.done.wait (%p862_p6), %s584_s5, 512  }
 0x1fb   : > { %1337 = vsyncadd (%p862_p6), %s584_s5, 4294966784  ;;  %s27_s14 = sadd.s32 1, %s1424_s14   ;;  %s2088_s18 = sld [smem:[#allocation19_spill]] }
 0x1fc   : > { %p1894_p1 = scmp.ge.s32.totalorder %s27_s14, 18   ;;  %s2089_s19 = sld [smem:[#allocation20_spill]] }
 0x1fd   : > { %s2090_s20 = sld [smem:[#allocation42_spill]]  ;;  %s2103_s21 = smov %s1356_s22 }
 0x1fe   : > { %s2091_s7 = sld [smem:[#allocation21_spill]]  ;;  %s2108_s26 = smov %s1771_s16 }
 0x1ff   : > { %s2092_s23 = sld [smem:[#allocation40_spill]]  ;;  %s2111_s8 = smov %s1412_s11 }
 0x200   : > { %s2093_s24 = sld [smem:[#allocation23_spill]]  ;;  %s2112_s9 = smov %s1416_s12 }
 0x201   : > { %s2094_s25 = sld [smem:[#allocation24_spill]] }
 0x202   : > { %s2095_s27 = sld [smem:[#allocation25_spill]] }
 0x203   : > { %s2096_s28 = sld [smem:[#allocation26_spill]] }
 0x204   : > { %s2097_s29 = sld [smem:[#allocation37_spill]]  ;;  %s2105_s22 = smov %s2091_s7 }
 0x205   : > { %s2098_s30 = sld [smem:[#allocation28_spill]] }
 0x206   : > { %s2099_s4 = sld [smem:[#allocation29_spill]] }
 0x207   : > { %s2100_s10 = sld [smem:[#allocation44_spill]] }
 0x208   : > { %s2101_s15 = sld [smem:[#allocation33_spill]] }
 0x209   : > { %s2102_s13 = sld [smem:[#allocation34_spill]] }
 0x20a   : > { %s2104_s17 = sld [smem:[#allocation35_spill]] }
 0x20b   : > { %s2106_s0 = sld [smem:[#allocation38_spill]] }
 0x20c   : > { %s2109_s6 = smov %s2099_s4 }
 0x20d   : > { %s2110_s7 = smov %s2100_s10  ;;  %26 = sbr.rel (!%p1894_p1) target bundleno = 25 (0x19), region = 141 }
 0x20e   : > { %s2113_s10 = smov %s2101_s15 }
 0x20f   : > { %s2114_s11 = smov %s2102_s13 }
 0x210   : > { %s2115_s12 = smov %s2104_s17 }
 0x211   : > { %s2116_s13 = smov %s2106_s0 }
 0x212   :  { %590 = vsyncpa [#allocation4], 1 }
 0x213   :  { %592 = vsyncpa [#allocation4 + $0x1], 1 }
 0x214   :  { %593 = vsyncpa [#allocation7], 1 }
 0x215   :  { %595 = vsyncpa [#allocation7 + $0x1], 1 }
 0x216   :  { %596 = vsyncpa [#allocation10], 1 }
 0x217   :  { %598 = vsyncpa [#allocation10 + $0x1], 1 }
 0x218   :  { %599 = vsyncpa [#allocation5], 1 }
 0x219   :  { %601 = vsyncpa [#allocation5 + $0x1], 1 }

</bundles_post_ra>
